<compile_context>
chip_gen: v6e
topology: v6e:2x2x1
jax: 0.10.0
libtpu: 0.0.40
codegen_flags: <defaults>
</compile_context>

<pallas_src>
import functools

import jax
import jax.numpy as jnp
from jax.experimental import pallas as pl
from jax.experimental.pallas import tpu as pltpu

_LANE = 128  # TPU lane width


def _combined_kernel(n_layer, n_class, x_ref, w1_ref, b1_ref, *refs):
    """refs = [w2, b2, ... (n_layer-1 pairs) ..., wh, bh, out_ref]."""
    *hidden_refs, wh_ref, bh_ref, out_ref = refs

    # ---- hidden stack (MXU matmuls, f32 accumulation, VPU relu) ----
    h = jnp.maximum(
        jnp.dot(x_ref[...], w1_ref[...], preferred_element_type=jnp.float32)
        + b1_ref[...], 0.0)
    for li in range(n_layer - 1):  # static unroll, mirrors `if self.n_layer > k`
        wk = hidden_refs[2 * li]
        bk = hidden_refs[2 * li + 1]
        h = jnp.maximum(
            jnp.dot(h.astype(wk.dtype), wk[...], preferred_element_type=jnp.float32)
            + bk[...], 0.0)

    # ---- fused heads: one (TB, 128) matmul; cols [0:n_class]=class logits, col n_class=reg
    head = jnp.dot(h.astype(wh_ref.dtype), wh_ref[...],
                   preferred_element_type=jnp.float32) + bh_ref[...]

    lane = jax.lax.broadcasted_iota(jnp.int32, head.shape, dimension=1)
    cls_mask = lane < n_class
    reg_mask = lane == n_class

    # numerically-stable softmax restricted to the class lanes (padding lanes -> -inf -> 0)
    logits = jnp.where(cls_mask, head, -jnp.inf)
    m = jnp.max(logits, axis=-1, keepdims=True)
    e = jnp.exp(logits - m)
    probs = e / jnp.sum(e, axis=-1, keepdims=True)   # exact divide: row sums == 1

    # lane-dense combined output: probs | reg | zeros
    out_ref[...] = jnp.where(
        cls_mask, probs, jnp.where(reg_mask, head, 0.0)).astype(out_ref.dtype)


def prepare_params(params, n_layer=1, param_dtype=jnp.bfloat16):
    """One-time parameter prep (pad, fuse heads, cast) -- keep OFF the forward path."""
    n_layer = max(1, min(int(n_layer), 4))
    n_hidden = params["w1"].shape[1]
    n_class = params["wo"].shape[1]
    assert n_class + 1 <= _LANE, "fused head assumes n_class + 1 <= 128"

    # pad hidden width to a lane multiple (exact: zero rows/cols contribute nothing)
    nh_p = max(_LANE, ((n_hidden + _LANE - 1) // _LANE) * _LANE)

    def pad_cols(a, n):
        return jnp.pad(a, ((0, 0), (0, n - a.shape[1])))

    def pad_rows(a, n):
        return jnp.pad(a, ((0, n - a.shape[0]), (0, 0)))

    w1 = pad_cols(params["w1"], nh_p).astype(param_dtype)
    b1 = pad_cols(params["b1"], nh_p).astype(jnp.float32)

    hidden = []
    for k in range(2, n_layer + 1):
        hidden.append(pad_rows(pad_cols(params[f"w{k}"], nh_p), nh_p).astype(param_dtype))
        hidden.append(pad_cols(params[f"b{k}"], nh_p).astype(jnp.float32))

    # fuse classification + regression heads into one (nh_p, 128) weight
    wh = jnp.zeros((n_hidden, _LANE), jnp.float32)
    wh = wh.at[:, :n_class].set(params["wo"])
    wh = wh.at[:, n_class:n_class + 1].set(params["wo2"])
    wh = pad_rows(wh, nh_p).astype(param_dtype)
    bh = jnp.zeros((1, _LANE), jnp.float32)
    bh = bh.at[:, :n_class].set(params["bo"])
    bh = bh.at[:, n_class:n_class + 1].set(params["bo2"])

    weights = (w1, b1, *hidden, wh, bh)
    return dict(weights=weights, n_layer=n_layer, n_class=n_class,
                param_dtype=param_dtype)


def combined_model_forward(x, prep):
    """CombinedModel forward in a single batch-tiled Pallas kernel.

    x: [batch, 768] float32
    prep: output of prepare_params().
    returns (probs [batch, n_class] f32, reg [batch, 1] f32)
    """
    n_layer = prep["n_layer"]
    n_class = prep["n_class"]
    weights = prep["weights"]
    param_dtype = prep["param_dtype"]

    batch, in_dim = x.shape
    x = x.astype(param_dtype)  # halve x streaming bytes (f32 accumulation in-kernel)

    # --- batch tiling ---
    def round8(n):
        return max(8, ((n + 7) // 8) * 8)

    if batch >= 2 * 1024:
        TB = 1024                         # big tile amortizes per-grid-step overhead
    elif batch >= 16:
        TB = round8(pl.cdiv(batch, 2))    # grid >= 2 so both v7x TensorCores get work
    else:
        TB = round8(batch)
    grid_n = pl.cdiv(batch, TB)
    batch_p = grid_n * TB
    # pad x only when actually needed (jnp.pad is a full HBM copy)
    x_p = jnp.pad(x, ((0, batch_p - batch), (0, 0))) if batch_p != batch else x

    # --- specs: x streamed per tile, weights resident, lane-dense bf16 output slab ---
    in_specs = [pl.BlockSpec((TB, in_dim), lambda i: (i, 0))]
    in_specs += [pl.BlockSpec(a.shape, lambda i: (0, 0)) for a in weights]
    out_spec = pl.BlockSpec((TB, _LANE), lambda i: (i, 0))

    # --- VMEM budget: only raise the scoped limit when the working set needs it ---
    itemsize = jnp.dtype(param_dtype).itemsize
    weight_bytes = sum(int(a.size) * a.dtype.itemsize for a in weights)
    est_vmem = 2 * (TB * in_dim * itemsize) + 2 * (TB * _LANE * 2) + 2 * weight_bytes
    cp_kwargs = dict(dimension_semantics=("parallel",))
    if est_vmem > (16 << 20):
        # cap with headroom under v7x's 64 MiB physical VMEM
        cp_kwargs["vmem_limit_bytes"] = min(int(est_vmem * 1.5), 56 << 20)

    kernel = functools.partial(_combined_kernel, n_layer, n_class)

    out = pl.pallas_call(
        kernel,
        out_shape=jax.ShapeDtypeStruct((batch_p, _LANE), jnp.bfloat16),
        grid=(grid_n,),
        in_specs=in_specs,
        out_specs=out_spec,
        compiler_params=pltpu.CompilerParams(**cp_kwargs),
    )(x_p, *weights)

    probs = out[:batch, :n_class].astype(jnp.float32)
    reg = out[:batch, n_class:n_class + 1].astype(jnp.float32)
    return probs, reg


def init_params(key, n_hidden, n_class_output, in_dim=768):
    """Deterministic synthetic parameters matching the nn.Linear shapes in __init__.

    PyTorch stores Linear weight as (out, in); we keep them transposed (in, out) so the
    kernel computes x @ W directly. Biases stored as (1, out) for broadcasting.
    """
    keys = jax.random.split(key, 12)

    def lin(kw, kb, fan_in, fan_out):
        bound = 1.0 / jnp.sqrt(fan_in)
        w = jax.random.uniform(kw, (fan_in, fan_out), jnp.float32, -bound, bound)
        b = jax.random.uniform(kb, (1, fan_out), jnp.float32, -bound, bound)
        return w, b

    w1, b1 = lin(keys[0], keys[1], in_dim, n_hidden)
    w2, b2 = lin(keys[2], keys[3], n_hidden, n_hidden)
    w3, b3 = lin(keys[4], keys[5], n_hidden, n_hidden)
    w4, b4 = lin(keys[6], keys[7], n_hidden, n_hidden)
    wo, bo = lin(keys[8], keys[9], n_hidden, n_class_output)
    wo2, bo2 = lin(keys[10], keys[11], n_hidden, 1)
    return dict(w1=w1, b1=b1, w2=w2, b2=b2, w3=w3, b3=b3, w4=w4, b4=b4,
                wo=wo, bo=bo, wo2=wo2, bo2=bo2)


def reference_forward(x, p, n_layer=1):
    """Pure-JAX f32 reference for correctness checking."""
    h = jnp.maximum(x @ p["w1"] + p["b1"], 0.0)
    if n_layer > 1:
        h = jnp.maximum(h @ p["w2"] + p["b2"], 0.0)
    if n_layer > 2:
        h = jnp.maximum(h @ p["w3"] + p["b3"], 0.0)
    if n_layer > 3:
        h = jnp.maximum(h @ p["w4"] + p["b4"], 0.0)
    probs = jax.nn.softmax(h @ p["wo"] + p["bo"], axis=-1)
    reg = h @ p["wo2"] + p["bo2"]
    return probs, reg


if __name__ == "__main__":
    key = jax.random.PRNGKey(0)
    k_x, k_p = jax.random.split(key)

    batch = 8
    in_dim = 768          # BERT-style embedding size, fixed by the module
    n_hidden = 32
    n_class = 4

    x = jax.random.normal(k_x, (batch, in_dim), dtype=jnp.float32)
    params = init_params(k_p, n_hidden, n_class, in_dim)

    # bf16 weights/inputs with f32 accumulation -> compare against f32 reference
    # with bf16-appropriate tolerances.
    for n_layer in (1, 2):   # exercise the default path and the hidden-stack path
        prep = prepare_params(params, n_layer=n_layer)
        probs, reg = combined_model_forward(x, prep)
        probs = jax.block_until_ready(probs)
        reg = jax.block_until_ready(reg)

        ref_probs, ref_reg = reference_forward(x, params, n_layer=n_layer)

        assert probs.shape == (batch, n_class)
        assert reg.shape == (batch, 1)
        assert jnp.allclose(probs, ref_probs, atol=2e-2, rtol=2e-2), (
            f"probs mismatch (n_layer={n_layer})")
        assert jnp.allclose(reg, ref_reg, atol=2e-2, rtol=2e-2), (
            f"reg mismatch (n_layer={n_layer})")
        # softmax rows sum to 1 (up to bf16 output rounding)
        assert jnp.allclose(jnp.sum(probs, axis=-1), jnp.ones((batch,)), atol=2e-2)

    print("KERNEL_OK")
</pallas_src>

<mosaic_0001>
module attributes {stable_mosaic.version = 11 : i64} {
  func.func @_combined_kernel(%arg0: i32, %arg1: memref<8x768xbf16, #tpu.memory_space<vmem>>, %arg2: memref<768x128xbf16, #tpu.memory_space<vmem>>, %arg3: memref<1x128xf32, #tpu.memory_space<vmem>>, %arg4: memref<128x128xbf16, #tpu.memory_space<vmem>>, %arg5: memref<1x128xf32, #tpu.memory_space<vmem>>, %arg6: memref<8x128xbf16, #tpu.memory_space<vmem>>) attributes {dimension_semantics = [#tpu.dimension_semantics<parallel>], iteration_bounds = array<i64: 1>, scalar_prefetch = 0 : i64, scratch_operands = 0 : i64, tpu.core_type = #tpu.core_type<tc>, window_params = [{transform_indices = @transform_0, window_bounds = array<i64: 8, 768>}, {pipeline_mode = #tpu.pipeline_mode<synchronous>, transform_indices = @transform_1, window_bounds = array<i64: 768, 128>}, {pipeline_mode = #tpu.pipeline_mode<synchronous>, transform_indices = @transform_2, window_bounds = array<i64: 1, 128>}, {pipeline_mode = #tpu.pipeline_mode<synchronous>, transform_indices = @transform_3, window_bounds = array<i64: 128, 128>}, {pipeline_mode = #tpu.pipeline_mode<synchronous>, transform_indices = @transform_4, window_bounds = array<i64: 1, 128>}, {transform_indices = @transform_5, window_bounds = array<i64: 8, 128>}]} {
    %c0 = arith.constant 0 : index
    %c0_0 = arith.constant 0 : index
    %0 = vector.load %arg1[%c0, %c0_0] : memref<8x768xbf16, #tpu.memory_space<vmem>>, vector<8x768xbf16>
    %c0_1 = arith.constant 0 : index
    %c0_2 = arith.constant 0 : index
    %1 = vector.load %arg2[%c0_1, %c0_2] : memref<768x128xbf16, #tpu.memory_space<vmem>>, vector<768x128xbf16>
    %cst = arith.constant dense<0.000000e+00> : vector<8x128xf32>
    %2 = tpu.matmul %0, %1, %cst {dimension_numbers = #tpu.dot_dimension_numbers<[1], [0], [0], [1], [0, 0, 1, 1], [], []>} : vector<8x768xbf16>, vector<768x128xbf16>, vector<8x128xf32> -> vector<8x128xf32>
    %c0_3 = arith.constant 0 : index
    %c0_4 = arith.constant 0 : index
    %3 = vector.load %arg3[%c0_3, %c0_4] : memref<1x128xf32, #tpu.memory_space<vmem>>, vector<1x128xf32>
    %4 = vector.broadcast %3 : vector<1x128xf32> to vector<8x128xf32>
    %5 = arith.addf %2, %4 : vector<8x128xf32>
    %cst_5 = arith.constant 0.000000e+00 : f32
    %6 = vector.broadcast %cst_5 : f32 to vector<8x128xf32>
    %7 = arith.maximumf %5, %6 : vector<8x128xf32>
    %8 = arith.truncf %7 : vector<8x128xf32> to vector<8x128xbf16>
    %c0_6 = arith.constant 0 : index
    %c0_7 = arith.constant 0 : index
    %9 = vector.load %arg4[%c0_6, %c0_7] : memref<128x128xbf16, #tpu.memory_space<vmem>>, vector<128x128xbf16>
    %cst_8 = arith.constant dense<0.000000e+00> : vector<8x128xf32>
    %10 = tpu.matmul %8, %9, %cst_8 {dimension_numbers = #tpu.dot_dimension_numbers<[1], [0], [0], [1], [0, 0, 1, 1], [], []>} : vector<8x128xbf16>, vector<128x128xbf16>, vector<8x128xf32> -> vector<8x128xf32>
    %c0_9 = arith.constant 0 : index
    %c0_10 = arith.constant 0 : index
    %11 = vector.load %arg5[%c0_9, %c0_10] : memref<1x128xf32, #tpu.memory_space<vmem>>, vector<1x128xf32>
    %12 = vector.broadcast %11 : vector<1x128xf32> to vector<8x128xf32>
    %13 = arith.addf %10, %12 : vector<8x128xf32>
    %14 = tpu.iota {dimensions = array<i32: 1>} : vector<8x128xi32>
    %c4_i32 = arith.constant 4 : i32
    %15 = vector.broadcast %c4_i32 : i32 to vector<8x128xi32>
    %16 = arith.cmpi slt, %14, %15 : vector<8x128xi32>
    %c4_i32_11 = arith.constant 4 : i32
    %17 = vector.broadcast %c4_i32_11 : i32 to vector<8x128xi32>
    %18 = arith.cmpi eq, %14, %17 : vector<8x128xi32>
    %cst_12 = arith.constant 0xFF800000 : f32
    %19 = vector.broadcast %cst_12 : f32 to vector<8x128xf32>
    %20 = arith.select %16, %13, %19 : vector<8x128xi1>, vector<8x128xf32>
    %cst_13 = arith.constant dense<0xFF800000> : vector<8xf32>
    %21 = vector.multi_reduction <maximumf>, %20, %cst_13 [1] : vector<8x128xf32> to vector<8xf32>
    %22 = vector.shape_cast %21 : vector<8xf32> to vector<8x1xf32>
    %23 = vector.broadcast %22 : vector<8x1xf32> to vector<8x128xf32>
    %24 = arith.subf %20, %23 : vector<8x128xf32>
    %25 = math.exp %24 : vector<8x128xf32>
    %cst_14 = arith.constant dense<0.000000e+00> : vector<8xf32>
    %26 = vector.multi_reduction <add>, %25, %cst_14 [1] : vector<8x128xf32> to vector<8xf32>
    %27 = vector.shape_cast %26 : vector<8xf32> to vector<8x1xf32>
    %28 = vector.broadcast %27 : vector<8x1xf32> to vector<8x128xf32>
    %29 = arith.divf %25, %28 : vector<8x128xf32>
    %cst_15 = arith.constant 0.000000e+00 : f32
    %30 = vector.broadcast %cst_15 : f32 to vector<8x128xf32>
    %31 = arith.select %18, %13, %30 : vector<8x128xi1>, vector<8x128xf32>
    %32 = arith.select %16, %29, %31 : vector<8x128xi1>, vector<8x128xf32>
    %33 = arith.truncf %32 : vector<8x128xf32> to vector<8x128xbf16>
    %c0_16 = arith.constant 0 : index
    %c0_17 = arith.constant 0 : index
    %34 = vector.load %arg6[%c0_16, %c0_17] : memref<8x128xbf16, #tpu.memory_space<vmem>>, vector<8x128xbf16>
    tpu.vector_store %arg6[%c0_16, %c0_17], %33 {strides = array<i32>} : memref<8x128xbf16, #tpu.memory_space<vmem>>, vector<8x128xbf16>,
    return
  }
  func.func @transform_0(%arg0: i32) -> (i32, i32) {
    %c0_i32 = arith.constant 0 : i32
    %c0_i32_0 = arith.constant 0 : i32
    return %arg0, %c0_i32 : i32, i32
  }
  func.func @transform_1(%arg0: i32) -> (i32, i32) {
    %c0_i32 = arith.constant 0 : i32
    %c0_i32_0 = arith.constant 0 : i32
    %c0_i32_1 = arith.constant 0 : i32
    return %c0_i32, %c0_i32_0 : i32, i32
  }
  func.func @transform_2(%arg0: i32) -> (i32, i32) {
    %c0_i32 = arith.constant 0 : i32
    %c0_i32_0 = arith.constant 0 : i32
    %c0_i32_1 = arith.constant 0 : i32
    return %c0_i32, %c0_i32_0 : i32, i32
  }
  func.func @transform_3(%arg0: i32) -> (i32, i32) {
    %c0_i32 = arith.constant 0 : i32
    %c0_i32_0 = arith.constant 0 : i32
    %c0_i32_1 = arith.constant 0 : i32
    return %c0_i32, %c0_i32_0 : i32, i32
  }
  func.func @transform_4(%arg0: i32) -> (i32, i32) {
    %c0_i32 = arith.constant 0 : i32
    %c0_i32_0 = arith.constant 0 : i32
    %c0_i32_1 = arith.constant 0 : i32
    return %c0_i32, %c0_i32_0 : i32, i32
  }
  func.func @transform_5(%arg0: i32) -> (i32, i32) {
    %c0_i32 = arith.constant 0 : i32
    %c0_i32_0 = arith.constant 0 : i32
    return %arg0, %c0_i32 : i32, i32
  }
}

</mosaic_0001>

<bundles_post_ra>
// kernel: tpu_custom_call.1
= control target key start
LH: loop header
LB: loop body
LE: loop exit
PB: predicated region body
PF: predicated region fallthrough
CT: control target
= control target key end

     0   :  { %10 = vsyncpa [#allocation3], 0  ;;  %s1120_s0 = inlined_call_operand.hbm [shape: bf16[8,768], index: 0, kind: input, shape index: {}]   ;;  %s1121_s1 = inlined_call_operand.hbm [shape: bf16[768,128], index: 1, kind: input, shape index: {}]   ;;  %s1122_s2 = inlined_call_operand.vmem [shape: f32[1,128], index: 2, kind: input, shape index: {}]   ;;  %s1123_s3 = inlined_call_operand.hbm [shape: bf16[128,128], index: 3, kind: input, shape index: {}]   ;;  %s1124_s4 = inlined_call_operand.vmem [shape: f32[1,128], index: 4, kind: input, shape index: {}]   ;;  %s1125_s5 = inlined_call_operand.hbm [shape: bf16[8,128], index: 5, kind: output, shape index: {}]  }
   0x1   :  { %11 = vsyncpa [#allocation6], 0 }
   0x2   :  { %12 = vsyncpa [#allocation4], 0  ;;  %s1062_s18 = smov [#allocation5]  }
   0x3   :  { %s28_s19 = sshll.u32 %s1062_s18, 4  ;;  %s29_s19 = int_to_ptr.vmem [resolvable:$true] %s28_s19 }
   0x4   :  { %s984_s20 = scalar_lea.vmem %s29_s19, 6144  ;;  %p989_p1 = scmp.lt.s32.totalorder %s29_s19, %s29_s19 }
   0x5   :  { %p985_p0 = scmp.ne.s32.totalorder %s29_s19, %s984_s20  ;;  %p990_p2 = scmp.lt.s32.totalorder %s984_s20, %s984_s20 }
   0x7   :  { %p991_p3 = por %p990_p2, %p989_p1 }
   0x9   :  { %p992_p4 = pnand %p991_p3, %p985_p0 }
   0xb   :  { %995 = shalt.err (!%p992_p4)
}
   0xc   :  { %s1063_s21 = smov 64   ;;  %s1064_s22 = smov 4  }
   0xd   :  { %34 = dma.hbm_to_vmem [thread:$0]  %s1121_s1, 6144, %s29_s19, [#allocation6], %s1063_s21, %s1063_s21, %s1064_s22  }
   0xe   :  { %s1065_s25 = smov [#allocation2]   ;;  %s1066_s27 = smov [#allocation7]  }
   0xf   :  { %s19_s26 = sshll.u32 %s1065_s25, 4  ;;  %s42_s28 = sshll.u32 %s1066_s27, 4  ;;  %s20_s26 = int_to_ptr.vmem [resolvable:$true] %s19_s26  ;;  %s43_s28 = int_to_ptr.vmem [resolvable:$true] %s42_s28 }
  0x10   :  { %s1004_s29 = scalar_lea.vmem %s20_s26, 384  ;;  %p1009_p6 = scmp.lt.s32.totalorder %s20_s26, %s20_s26 }
  0x11   :  { %p1005_p5 = scmp.ne.s32.totalorder %s20_s26, %s1004_s29  ;;  %p1010_p7 = scmp.lt.s32.totalorder %s1004_s29, %s1004_s29 }
  0x13   :  { %p1011_p8 = por %p1010_p7, %p1009_p6 }
  0x15   :  { %p1012_p9 = pnand %p1011_p8, %p1005_p5 }
  0x17   :  { %1015 = shalt.err (!%p1012_p9)
}
  0x18   :  { %22 = dma.hbm_to_vmem [thread:$0]  %s1120_s0, 384, %s20_s26, [#allocation3]  }
  0x19   :  { %s1024_s7 = scalar_lea.vmem %s43_s28, 1024  ;;  %p1029_p11 = scmp.lt.s32.totalorder %s43_s28, %s43_s28 }
  0x1a   :  { %p1025_p10 = scmp.ne.s32.totalorder %s43_s28, %s1024_s7  ;;  %p1030_p12 = scmp.lt.s32.totalorder %s1024_s7, %s1024_s7 }
  0x1c   :  { %p1031_p13 = por %p1030_p12, %p1029_p11 }
  0x1e   :  { %p1032_p0 = pnand %p1031_p13, %p1025_p10 }
  0x20   :  { %1035 = shalt.err (!%p1032_p0)
}
  0x21   :  { %48 = dma.hbm_to_vmem [thread:$0]  %s1123_s3, 1024, %s43_s28, [#allocation6], %s1063_s21, %s1063_s21, %s1064_s22  }
  0x22   :  { %1056 = dma.done.wait [#allocation3], 384  }
  0x23   :  { %1057 = vsyncadd [#allocation3], 4294966912 }
  0x24   :  { %1058 = dma.done.wait [#allocation6], 7168  }
  0x25   :  { %1059 = vsyncadd [#allocation6], 4294960128  ;;  %v910_v0 = vld [vmem:[#allocation5 + $0x78] sm:$0xff]   ;;  %v914_v4 = vld [vmem:[#allocation5 + $0x70] sm:$0xff]   ;;  %v1067_v58 = vmov 0.0   ;;  %vm1068_vm0 = vmmov 0  }
  0x26   :  { %v911_v1 = vld [vmem:[#allocation5 + $0x38] sm:$0xff]   ;;  %807 = vmatprep.subr.bf16.mxu0 %v910_v0  ;;  %v915_v5 = vld [vmem:[#allocation5 + $0x30] sm:$0xff]   ;;  %v918_v8 = vld [vmem:[#allocation5 + $0x68] sm:$0xff]  }
  0x27   :  { %v912_v2 = vld [vmem:[#allocation5 + $0xf8] sm:$0xff]   ;;  %808 = vmatpush3.bf16.msra.mxu0 %v911_v1  ;;  %v916_v6 = vld [vmem:[#allocation5 + $0xf0] sm:$0xff]   ;;  %v919_v9 = vld [vmem:[#allocation5 + $0x28] sm:$0xff]  }
  0x28   :  { %v913_v3 = vld [vmem:[#allocation5 + $0xb8] sm:$0xff]   ;;  %829 = vmatprep.subr.bf16.mxu1 %v912_v2  ;;  %809 = vmatprep.subr.bf16.mxu0 %v914_v4  ;;  %v917_v7 = vld [vmem:[#allocation5 + $0xb0] sm:$0xff]   ;;  %v920_v10 = vld [vmem:[#allocation5 + $0xe8] sm:$0xff]  }
  0x29   :  { %830 = vmatpush3.bf16.msra.mxu1 %v913_v3  ;;  %v921_v11 = vld [vmem:[#allocation5 + $0xa8] sm:$0xff]   ;;  %v922_v12 = vld [vmem:[#allocation5 + $0x60] sm:$0xff]   ;;  %v926_v16 = vld [vmem:[#allocation5 + $0x58] sm:$0xff]  }
  0x2a   :  { %831 = vmatprep.subr.bf16.mxu1 %v916_v6  ;;  %v923_v13 = vld [vmem:[#allocation5 + $0x20] sm:$0xff]   ;;  %v927_v17 = vld [vmem:[#allocation5 + $0x18] sm:$0xff]   ;;  %v930_v20 = vld [vmem:[#allocation5 + $0x50] sm:$0xff]  }
  0x2b   :  { %810 = vmatpush3.bf16.msra.mxu0 %v915_v5  ;;  %v924_v14 = vld [vmem:[#allocation5 + $0xe0] sm:$0xff]   ;;  %v928_v18 = vld [vmem:[#allocation5 + $0xd8] sm:$0xff]   ;;  %v931_v21 = vld [vmem:[#allocation5 + $0x10] sm:$0xff]  }
  0x2c   :  { %811 = vmatprep.subr.bf16.mxu0 %v918_v8  ;;  %v925_v15 = vld [vmem:[#allocation5 + $0xa0] sm:$0xff]   ;;  %v929_v19 = vld [vmem:[#allocation5 + $0x98] sm:$0xff]   ;;  %v932_v22 = vld [vmem:[#allocation5 + $0xd0] sm:$0xff]  }
  0x2d   :  { %832 = vmatpush3.bf16.msra.mxu1 %v917_v7  ;;  %v933_v23 = vld [vmem:[#allocation5 + $0x90] sm:$0xff]   ;;  %v934_v24 = vld [vmem:[#allocation5 + $0x48] sm:$0xff]   ;;  %v938_v28 = vld [vmem:[#allocation5 + $0x40] sm:$0xff]  }
  0x2e   :  { %833 = vmatprep.subr.bf16.mxu1 %v920_v10  ;;  %v935_v25 = vld [vmem:[#allocation5 + $0x8] sm:$0xff]   ;;  %v939_v29 = vld [vmem:[#allocation5] sm:$0xff]   ;;  %v944_v35 = vld [vmem:[#allocation5 + $0x178] sm:$0xff]  }
  0x2f   :  { %812 = vmatpush3.bf16.msra.mxu0 %v919_v9  ;;  %v936_v26 = vld [vmem:[#allocation5 + $0xc8] sm:$0xff]   ;;  %v940_v30 = vld [vmem:[#allocation5 + $0xc0] sm:$0xff]   ;;  %v62_v36 = vld [vmem:[#allocation2 + $0x8] sm:$0xff] }
  0x30   :  { %813 = vmatprep.subr.bf16.mxu0 %v922_v12  ;;  %v937_v27 = vld [vmem:[#allocation5 + $0x88] sm:$0xff]   ;;  %v943_v34 = vld [vmem:[#allocation5 + $0x80] sm:$0xff]   ;;  %v746_v37 = vcombine.low %v62_v36, %v62_v36  ;;  %v747_v38 = vcombine.high %v62_v36, %v62_v36  ;;  %v947_v39 = vld [vmem:[#allocation5 + $0x138] sm:$0xff]  }
  0x31   :  { %834 = vmatpush3.bf16.msra.mxu1 %v921_v11  ;;  %v61_v31 = vld [vmem:[#allocation2] sm:$0xff]  ;;  %v948_v40 = vld [vmem:[#allocation5 + $0x170] sm:$0xff]   ;;  %v952_v44 = vld [vmem:[#allocation5 + $0x160] sm:$0xff]  }
  0x32   :  { %835 = vmatprep.subr.bf16.mxu1 %v924_v14  ;;  %v744_v32 = vcombine.low %v61_v31, %v61_v31  ;;  %v745_v33 = vcombine.high %v61_v31, %v61_v31  ;;  %548 = vmatprep.mubr.bf16.mxu1 %v747_v38  ;;  %v949_v41 = vld [vmem:[#allocation5 + $0x130] sm:$0xff]   ;;  %v950_v42 = vld [vmem:[#allocation5 + $0x168] sm:$0xff]   ;;  %v953_v45 = vld [vmem:[#allocation5 + $0x120] sm:$0xff]  }
  0x33   :  { %814 = vmatpush3.bf16.msra.mxu0 %v923_v13  ;;  %v951_v43 = vld [vmem:[#allocation5 + $0x128] sm:$0xff]   ;;  %v954_v46 = vld [vmem:[#allocation5 + $0x158] sm:$0xff]   ;;  %v956_v48 = vld [vmem:[#allocation5 + $0x150] sm:$0xff]  }
  0x34   :  { %815 = vmatprep.subr.bf16.mxu0 %v926_v16  ;;  %508 = vmatprep.mubr.bf16.mxu0 %v745_v33  ;;  %v955_v47 = vld [vmem:[#allocation5 + $0x118] sm:$0xff]   ;;  %v957_v51 = vld [vmem:[#allocation5 + $0x110] sm:$0xff]   ;;  %v958_v52 = vld [vmem:[#allocation5 + $0x148] sm:$0xff]  }
  0x35   :  { %836 = vmatpush3.bf16.msra.mxu1 %v925_v15  ;;  %v63_v49 = vld [vmem:[#allocation2 + $0x10] sm:$0xff]  ;;  %v959_v53 = vld [vmem:[#allocation5 + $0x108] sm:$0xff]   ;;  %v960_v54 = vld [vmem:[#allocation5 + $0x140] sm:$0xff]  }
  0x36   :  { %837 = vmatprep.subr.bf16.mxu1 %v928_v18  ;;  %v749_v50 = vcombine.high %v63_v49, %v63_v49  ;;  %v961_v55 = vld [vmem:[#allocation5 + $0x100] sm:$0xff]   ;;  %v748_v56 = vcombine.low %v63_v49, %v63_v49  ;;  %v964_v57 = vld [vmem:[#allocation7 + $0x38] sm:$0xff]   ;;  %v965_v59 = vld [vmem:[#allocation7 + $0x30] sm:$0xff]  }
  0x37   :  { %816 = vmatpush3.bf16.msra.mxu0 %v927_v17  ;;  %v966_v60 = vld [vmem:[#allocation7 + $0x28] sm:$0xff]   ;;  %v967_v61 = vld [vmem:[#allocation7 + $0x20] sm:$0xff]   ;;  %v968_v62 = vld [vmem:[#allocation7 + $0x18] sm:$0xff]  }
  0x38   :  { %817 = vmatprep.subr.bf16.mxu0 %v930_v20  ;;  %v969_v63 = vld [vmem:[#allocation7 + $0x10] sm:$0xff]   ;;  %v970_v0 = vld [vmem:[#allocation7 + $0x8] sm:$0xff]   ;;  %v971_v1 = vld [vmem:[#allocation7] sm:$0xff]  }
  0x39   :  { %838 = vmatpush3.bf16.msra.mxu1 %v929_v19  ;;  %v743_v11 = vld [vmem:[%s1122_s2] ss:$0 sm:$0xff]  ;;  %s1069_s2 = smov [#allocation8]  }
  0x3a   :  { %839 = vmatprep.subr.bf16.mxu1 %v932_v22 }
  0x3b   :  { %818 = vmatpush3.bf16.msra.mxu0 %v931_v21 }
  0x3c   :  { %819 = vmatprep.subr.bf16.mxu0 %v934_v24 }
  0x3d   :  { %840 = vmatpush3.bf16.msra.mxu1 %v933_v23  ;;  %v709_v23 = vlaneseq }
  0x3e   :  { %841 = vmatprep.subr.bf16.mxu1 %v936_v26 }
  0x3f   :  { %820 = vmatpush3.bf16.msra.mxu0 %v935_v25  ;;  %v710_v24 = vand.u32 127, %v709_v23  ;;  %v798_v25 = vld [vmem:[%s1124_s4] ss:$0 sm:$0xff]  ;;  %s733_s4 = sshll.u32 %s1069_s2, 4  ;;  %s734_s4 = int_to_ptr.vmem [resolvable:$true] %s733_s4 }
  0x40   :  { %821 = vmatprep.subr.bf16.mxu0 %v938_v28  ;;  %s1036_s11 = scalar_lea.vmem %s734_s4, 64  ;;  %p1041_p2 = scmp.lt.s32.totalorder %s734_s4, %s734_s4 }
  0x41   :  { %842 = vmatpush3.bf16.msra.mxu1 %v937_v27  ;;  %vm712_vm1 = vcmp.eq.s32.totalorder %v710_v24, 4  ;;  %vm711_vm2 = vcmp.lt.s32.totalorder %v710_v24, 4  ;;  %p1037_p1 = scmp.ne.s32.totalorder %s734_s4, %s1036_s11  ;;  %p1042_p3 = scmp.lt.s32.totalorder %s1036_s11, %s1036_s11 }
  0x42   :  { %843 = vmatprep.subr.bf16.mxu1 %v940_v30 }
  0x43   :  { %822 = vmatpush3.bf16.msra.mxu0 %v939_v29  ;;  %p1043_p4 = por %p1042_p3, %p1041_p2 }
  0x44   :  { %851 = vmatprep.subr.bf16.mxu0 %v944_v35 }
  0x45   :  { %844 = vmatpush3.bf16.msra.mxu1 %v943_v34  ;;  %p1044_p5 = pnand %p1043_p4, %p1037_p1 }
  0x46   :  { %509 = vmatmul.mubr.bf16.vlgmr.msra.gmra.mxu0 %v744_v32  ;;  %882 = vmatprep.subr.bf16.mxu1 %v1067_v58 }
  0x47   :  { %852 = vmatpush3.bf16.msra.mxu0 %v947_v39  ;;  %588 = vmatprep.mubr.bf16.mxu0 %v749_v50 }
  0x48   :  { %549 = vmatmul.mubr.bf16.vlgmr.msra.gmra.mxu1 %v746_v37  ;;  %853 = vmatprep.subr.bf16.mxu0 %v948_v40 }
  0x49   :  { %883 = vmatpush3.bf16.msra.mxu1 %v964_v57  ;;  %898 = vmatprep.mubr.msk.bf16.mxu1 %vm1068_vm0, %v1067_v58 }
  0x4a   :  { %884 = vmatprep.subr.bf16.mxu1 %v1067_v58 }
  0x4b   :  { %854 = vmatpush3.bf16.msra.mxu0 %v949_v41 }
  0x4c   :  { %855 = vmatprep.subr.bf16.mxu0 %v950_v42 }
  0x4d   :  { %885 = vmatpush3.bf16.msra.mxu1 %v965_v59 }
  0x4e   :  { %886 = vmatprep.subr.bf16.mxu1 %v1067_v58 }
  0x4f   :  { %856 = vmatpush3.bf16.msra.mxu0 %v951_v43 }
  0x50   :  { %857 = vmatprep.subr.bf16.mxu0 %v952_v44 }
  0x51   :  { %887 = vmatpush3.bf16.msra.mxu1 %v966_v60 }
  0x52   :  { %888 = vmatprep.subr.bf16.mxu1 %v1067_v58 }
  0x53   :  { %858 = vmatpush3.bf16.msra.mxu0 %v953_v45 }
  0x54   :  { %859 = vmatprep.subr.bf16.mxu0 %v954_v46 }
  0x55   :  { %889 = vmatpush3.bf16.msra.mxu1 %v967_v61 }
  0x56   :  { %890 = vmatprep.subr.bf16.mxu1 %v1067_v58 }
  0x57   :  { %860 = vmatpush3.bf16.msra.mxu0 %v955_v47 }
  0x58   :  { %861 = vmatprep.subr.bf16.mxu0 %v956_v48 }
  0x59   :  { %891 = vmatpush3.bf16.msra.mxu1 %v968_v62 }
  0x5a   :  { %892 = vmatprep.subr.bf16.mxu1 %v1067_v58 }
  0x5b   :  { %862 = vmatpush3.bf16.msra.mxu0 %v957_v51 }
  0x5c   :  { %863 = vmatprep.subr.bf16.mxu0 %v958_v52 }
  0x5d   :  { %893 = vmatpush3.bf16.msra.mxu1 %v969_v63 }
  0x5e   :  { %894 = vmatprep.subr.bf16.mxu1 %v1067_v58 }
  0x5f   :  { %864 = vmatpush3.bf16.msra.mxu0 %v959_v53 }
  0x60   :  { %865 = vmatprep.subr.bf16.mxu0 %v960_v54 }
  0x61   :  { %895 = vmatpush3.bf16.msra.mxu1 %v970_v0 }
  0x62   :  { %896 = vmatprep.subr.bf16.mxu1 %v1067_v58 }
  0x63   :  { %866 = vmatpush3.bf16.msra.mxu0 %v961_v55 }
  0x65   :  { %897 = vmatpush3.bf16.msra.mxu1 %v971_v1 }
  0x66   :  { %589 = vmatmul.mubr.bf16.vlgmr.msra.gmra.mxu0 %v748_v56 }
 0x106   :  { %v823_v2 = vpop.f32.mrf.mxu0 }
 0x108   :  { %v824_v3 = vpop.f32.mrf.mxu0  ;;  %v845_v4 = vpop.f32.mrf.mxu1 }
 0x109   :  { %v825_v10 = vadd.f32 %v824_v3, %v823_v2 }
 0x10a   :  { %v826_v5 = vpop.f32.mrf.mxu0  ;;  %v846_v6 = vpop.f32.mrf.mxu1 }
 0x10b   :  { %v511_v12 = vadd.f32 %v825_v10, %v743_v11  ;;  %v847_v13 = vadd.f32 %v846_v6, %v845_v4 }
 0x10c   :  { %v827_v7 = vpop.f32.mrf.mxu0  ;;  %v848_v8 = vpop.f32.mrf.mxu1 }
 0x10d   :  { %v551_v16 = vadd.f32 %v847_v13, %v511_v12 }
 0x10e   :  { %v849_v9 = vpop.f32.mrf.mxu1 }
 0x126   :  { %v867_v14 = vpop.f32.mrf.mxu0 }
 0x128   :  { %v868_v15 = vpop.f32.mrf.mxu0 }
 0x129   :  { %v869_v17 = vadd.f32 %v868_v15, %v867_v14 }
 0x12a   :  { %v870_v18 = vpop.f32.mrf.mxu0 }
 0x12b   :  { %v591_v19 = vadd.f32 %v869_v17, %v551_v16 }
 0x12c   :  { %v871_v20 = vpop.f32.mrf.mxu0 }
 0x12d   :  { %v596_v21 = vmax.f32 %v591_v19, 0.0 }
 0x12f   :  { %v597_v22 = vpack.c.bf16 %v596_v21, %v596_v21 }
 0x131   :  { %899 = vmatmul.mubr.bf16.vlgmr.msra.gmra.mxu1 %v597_v22 }
 0x1f1   :  { %v703_v26 = vpop.f32.mrf.mxu1 }
 0x1f2   :  { %v704_v27 = vadd.f32 %v798_v25, %v703_v26 }
 0x1f3   :  { %v900_v28 = vpop.f32.mrf.mxu1 }
 0x1f4   :  { %v723_v29 = vsel %vm712_vm1, %v704_v27, 0.0  ;;  %v713_v30 = vsel %vm711_vm2, %v704_v27, -inf }
 0x1f5   :  { %714 = vmax.xlane.f32.xlu0 %v713_v30  ;;  %v706_v31 = vpop.f32.mrf.mxu1 }
 0x1f7   :  { %v901_v32 = vpop.f32.mrf.mxu1 }
 0x27e   :  { %v715_v33 = vpop.xlane.xlu0 %714 }
 0x27f   :  { %v716_v34 = vsub.f32 %v713_v30, %v715_v33 }
 0x281   :  { %v717_v35 = vmul.f32 1.442695, %v716_v34 }
 0x283   :  { %972 = vpow2.f32 %v717_v35 }
 0x290   :  { %v973_v36 = vpop.eup %972 }
 0x291   :  { %719 = vadd.xlane.f32.xlu0 %v973_v36 }
 0x31a   :  { %v720_v37 = vpop.xlane.xlu0 %719 }
 0x31b   :  { %974 = vrcp.f32 %v720_v37 }
 0x328   :  { %v975_v38 = vpop.eup %974 }
 0x329   :  { %v722_v39 = vmul.f32 %v975_v38, %v973_v36 }
 0x32b   :  { %v724_v40 = vsel %vm711_vm2, %v722_v39, %v723_v29 }
 0x32c   :  { %v725_v41 = vpack.c.bf16 %v724_v40, %v724_v40 }
 0x32e   :  { %726 = vst [vmem:[#allocation8] sm:$0xf] %v725_v41 }
 0x32f   :  { %1047 = shalt.err (!%p1044_p5)
}
 0x330   :  { %736 = dma.vmem_to_hbm [thread:$0]  %s734_s4, 64, %s1125_s5, [#allocation4]  }
 0x331   :  { %1060 = dma.done.wait [#allocation4], 64  }
 0x332   :  { %1061 = vsyncadd [#allocation4], 4294967232 }
 0x333   :  { %740 = vsyncpa [#allocation3], 1 }
 0x334   :  { %741 = vsyncpa [#allocation6], 1 }
 0x335   :  { %742 = vsyncpa [#allocation4], 1 }

</bundles_post_ra>
